<compile_context>
chip_gen: v5e
topology: v5e:2x2
jax: 0.10.0
libtpu: 0.0.40
codegen_flags: <defaults>
</compile_context>

<pallas_src>
import jax
import jax.numpy as jnp
from jax.experimental import pallas as pl
from jax.experimental.pallas import tpu as pltpu

IN_FEATURES = 8
HIDDEN = 4
NUM_CLASS = 10
N_PAD = 128            # lane-dense output width (last dim padded to one full lane tile)
K_AUG = IN_FEATURES + 1  # x is augmented with a ones column; slab has 8 weight rows + 1 bias row


def _round_up(n, m):
    return ((n + m - 1) // m) * m


def fused_affine_kernel(x_ref, p_ref, o_ref):
    # x_ref: (TB, 9)  augmented input rows
    # p_ref: (9, 128) fused [W; b] slab, zero-padded in lanes 10..127 (resident)
    # o_ref: (TB, 128) lane-dense output tile -> unmasked stores
    o_ref[...] = jnp.dot(
        x_ref[...], p_ref[...], preferred_element_type=jnp.float32
    ).astype(o_ref.dtype)


def fuse_params(w1, b1, w2, b2, num_class=NUM_CLASS, dtype=jnp.float32):
    """One-time precompute: collapse fc1∘fc2 into a single affine map and pack
    [W; b] into one lane-dense (9, 128) slab.  Must be re-run whenever the
    underlying parameters change.  Only valid with NO nonlinearity between
    fc1 and fc2.  (For bandwidth-bound real batches on v6e/v7x, pass
    dtype=jnp.bfloat16 here and cast x likewise in net_forward.)"""
    w = w1 @ w2                     # (8, num_class)
    b = b1 @ w2 + b2                # (1, num_class)
    packed = jnp.concatenate([w, b], axis=0)              # (9, num_class)
    packed = jnp.pad(packed, ((0, 0), (0, N_PAD - num_class)))  # (9, 128) lane-dense
    return packed.astype(dtype)


def net_forward(x, packed_params, num_class=NUM_CLASS, block_rows=512):
    """out = fc2(fc1(x)) via one fused MXU pass.  Tiles the batch dimension;
    the parameter slab is a few KiB and stays VMEM-resident across the grid."""
    B = x.shape[0]
    # Batch tile: multiple of 8 sublanes; 512 rows at real batch sizes
    # (~85% of HBM roofline for mem-bound tiling), shrink only for tiny demos.
    tb = min(block_rows, _round_up(B, 8))
    tb = _round_up(tb, 8)
    Bp = _round_up(B, tb)

    # Fold the bias into the matmul: augment x with a ones column, pad rows.
    x = x.astype(packed_params.dtype)
    x_aug = jnp.concatenate([x, jnp.ones((B, 1), x.dtype)], axis=-1)   # (B, 9)
    if Bp != B:
        x_aug = jnp.pad(x_aug, ((0, Bp - B), (0, 0)))                  # (Bp, 9)

    grid = (Bp // tb,)
    bytes_per = jnp.dtype(packed_params.dtype).itemsize
    cost = pl.CostEstimate(
        flops=2 * Bp * K_AUG * N_PAD,
        transcendentals=0,
        bytes_accessed=bytes_per * (x_aug.size + packed_params.size) + 4 * Bp * N_PAD,
    )

    out = pl.pallas_call(
        fused_affine_kernel,
        out_shape=jax.ShapeDtypeStruct((Bp, N_PAD), jnp.float32),
        grid=grid,
        in_specs=[
            pl.BlockSpec((tb, K_AUG), lambda i: (i, 0)),   # batch tile of x_aug
            pl.BlockSpec((K_AUG, N_PAD), lambda i: (0, 0)),  # slab resident across grid
        ],
        out_specs=pl.BlockSpec((tb, N_PAD), lambda i: (i, 0)),
        compiler_params=pltpu.CompilerParams(
            dimension_semantics=("parallel",),
        ),
        cost_estimate=cost,
    )(x_aug, packed_params)

    return out[:B, :num_class]


def init_params(key, num_class=NUM_CLASS):
    # Deterministic init mimicking PyTorch nn.Linear default:
    # U(-1/sqrt(fan_in), 1/sqrt(fan_in)); weights stored transposed (in, out).
    k1, k2, k3, k4 = jax.random.split(key, 4)
    bound1 = 1.0 / jnp.sqrt(float(IN_FEATURES))
    w1 = jax.random.uniform(k1, (IN_FEATURES, HIDDEN), jnp.float32, -bound1, bound1)
    b1 = jax.random.uniform(k2, (1, HIDDEN), jnp.float32, -bound1, bound1)
    bound2 = 1.0 / jnp.sqrt(float(HIDDEN))
    w2 = jax.random.uniform(k3, (HIDDEN, num_class), jnp.float32, -bound2, bound2)
    b2 = jax.random.uniform(k4, (1, num_class), jnp.float32, -bound2, bound2)
    return w1, b1, w2, b2


if __name__ == "__main__":
    key = jax.random.PRNGKey(0)
    kx, kp = jax.random.split(key)
    # Matches the module's example input: x = torch.randn((3, 8))
    x = jax.random.normal(kx, (3, IN_FEATURES), dtype=jnp.float32)
    w1, b1, w2, b2 = init_params(kp, num_class=NUM_CLASS)

    packed = fuse_params(w1, b1, w2, b2)          # one-time precompute (re-run on param update)
    out = net_forward(x, packed)
    out = jax.block_until_ready(out)

    # Cross-check against the unfused two-step reference (fused f32 math
    # differs only by rounding, well inside tolerance).
    ref = (x @ w1 + b1) @ w2 + b2
    assert out.shape == (3, NUM_CLASS)
    assert jnp.allclose(out, ref, atol=1e-5, rtol=1e-5)
    print("KERNEL_OK")
</pallas_src>

<mosaic_0001>
module attributes {stable_mosaic.version = 11 : i64} {
  func.func @fused_affine_kernel(%arg0: i32, %arg1: memref<8x9xf32, #tpu.memory_space<vmem>>, %arg2: memref<9x128xf32, #tpu.memory_space<vmem>>, %arg3: memref<8x128xf32, #tpu.memory_space<vmem>>) attributes {dimension_semantics = [#tpu.dimension_semantics<parallel>], iteration_bounds = array<i64: 1>, scalar_prefetch = 0 : i64, scratch_operands = 0 : i64, tpu.core_type = #tpu.core_type<tc>, window_params = [{transform_indices = @transform_0, window_bounds = array<i64: 8, 9>}, {pipeline_mode = #tpu.pipeline_mode<synchronous>, transform_indices = @transform_1, window_bounds = array<i64: 9, 128>}, {transform_indices = @transform_2, window_bounds = array<i64: 8, 128>}]} {
    %c0 = arith.constant 0 : index
    %c0_0 = arith.constant 0 : index
    %0 = vector.load %arg1[%c0, %c0_0] : memref<8x9xf32, #tpu.memory_space<vmem>>, vector<8x9xf32>
    %c0_1 = arith.constant 0 : index
    %c0_2 = arith.constant 0 : index
    %1 = vector.load %arg2[%c0_1, %c0_2] : memref<9x128xf32, #tpu.memory_space<vmem>>, vector<9x128xf32>
    %cst = arith.constant dense<0.000000e+00> : vector<8x128xf32>
    %2 = tpu.matmul %0, %1, %cst {dimension_numbers = #tpu.dot_dimension_numbers<[1], [0], [0], [1], [0, 0, 1, 1], [], []>} : vector<8x9xf32>, vector<9x128xf32>, vector<8x128xf32> -> vector<8x128xf32>
    %c0_3 = arith.constant 0 : index
    %c0_4 = arith.constant 0 : index
    %3 = vector.load %arg3[%c0_3, %c0_4] : memref<8x128xf32, #tpu.memory_space<vmem>>, vector<8x128xf32>
    tpu.vector_store %arg3[%c0_3, %c0_4], %2 {strides = array<i32>} : memref<8x128xf32, #tpu.memory_space<vmem>>, vector<8x128xf32>,
    return
  }
  func.func @transform_0(%arg0: i32) -> (i32, i32) {
    %c0_i32 = arith.constant 0 : i32
    %c0_i32_0 = arith.constant 0 : i32
    return %arg0, %c0_i32 : i32, i32
  }
  func.func @transform_1(%arg0: i32) -> (i32, i32) {
    %c0_i32 = arith.constant 0 : i32
    %c0_i32_0 = arith.constant 0 : i32
    %c0_i32_1 = arith.constant 0 : i32
    return %c0_i32, %c0_i32_0 : i32, i32
  }
  func.func @transform_2(%arg0: i32) -> (i32, i32) {
    %c0_i32 = arith.constant 0 : i32
    %c0_i32_0 = arith.constant 0 : i32
    return %arg0, %c0_i32 : i32, i32
  }
}

</mosaic_0001>

<bundles_post_ra>
// kernel: tpu_custom_call.1
= control target key start
LH: loop header
LB: loop body
LE: loop exit
PB: predicated region body
PF: predicated region fallthrough
CT: control target
= control target key end

     0   :  { %7 = vsyncpa [#allocation3], 0  ;;  %s206_s0 = inlined_call_operand.hbm [shape: f32[8,9], index: 0, kind: input, shape index: {}]   ;;  %s207_s1 = inlined_call_operand.hbm [shape: f32[9,128], index: 1, kind: input, shape index: {}]   ;;  %s208_s2 = inlined_call_operand.hbm [shape: f32[8,128], index: 2, kind: output, shape index: {}]  }
   0x1   :  { %8 = vsyncpa [#allocation6], 0 }
   0x2   :  { %9 = vsyncpa [#allocation4], 0  ;;  %s15_s11 = sshll.u32 %s206_s0, 4  ;;  %s177_s12 = smov [#allocation2]   ;;  %s16_s11 = int_to_ptr.hbm [resolvable:$true] %s15_s11 }
   0x3   :  { %s17_s13 = sshll.u32 %s177_s12, 4  ;;  %s25_s16 = sshll.u32 %s207_s1, 4  ;;  %s18_s13 = int_to_ptr.vmem [resolvable:$true] %s17_s13  ;;  %s26_s16 = int_to_ptr.hbm [resolvable:$true] %s25_s16 }
   0x4   :  { %20 = dma.hbm_to_vmem [thread:$0]  %s16_s11, 128, %s18_s13, [#allocation3]  }
   0x5   :  { %s178_s17 = smov [#allocation5]   ;;  %s179_s19 = smov 128  }
   0x6   :  { %s27_s18 = sshll.u32 %s178_s17, 4  ;;  %s180_s20 = smov 8   ;;  %s28_s18 = int_to_ptr.vmem [resolvable:$true] %s27_s18 }
   0x7   :  { %33 = dma.hbm_to_vmem [thread:$0]  %s26_s16, 256, %s28_s18, [#allocation6], %s179_s19, %s179_s19, %s180_s20  }
   0x8   :  { %171 = dma.done.wait [#allocation3], 128  }
   0x9   :  { %172 = vsyncadd [#allocation3], 4294967168 }
   0xa   :  { %173 = dma.done.wait [#allocation6], 256  }
   0xb   :  { %174 = vsyncadd [#allocation6], 4294967040  ;;  %vm49_vm0 = vcmask 1040384   ;;  %v44_v0 = vld [vmem:[#allocation5 + $0x8] sm:$0x1]  ;;  %v43_v1 = vld [vmem:[#allocation5] sm:$0xff] }
   0xc   :  { %92 = vmatpush.msk.msra.mxu0 %vm49_vm0, %v44_v0  ;;  %v42_v2 = vld [vmem:[#allocation2] sm:$0xff]  ;;  %vm45_vm1 = vcmask 72704   ;;  %s181_s0 = smov [#allocation7]   ;;  %s81_s23 = sshll.u32 %s208_s2, 4  ;;  %s82_s23 = int_to_ptr.hbm [resolvable:$true] %s81_s23 }
   0xd   :  { %s79_s1 = sshll.u32 %s181_s0, 4  ;;  %s80_s1 = int_to_ptr.vmem [resolvable:$true] %s79_s1 }
   0xe   :  { %68 = vmatpush.msra.mxu0 %v43_v1 }
   0xf   :  { %93 = vmatmul.msk.f32.vlgmr.msra.gmra.mxu0 %vm45_vm1, %v42_v2 }
  0x8c   :  { %v70_v3 = vpop.f32.mrf.mxu0 }
  0x8d   :  { %73 = vst [vmem:[#allocation7] sm:$0xff] %v70_v3 }
  0x8e   :  { %84 = dma.vmem_to_hbm [thread:$0]  %s80_s1, 128, %s82_s23, [#allocation4]  }
  0x8f   :  { %175 = dma.done.wait [#allocation4], 128  }
  0x90   :  { %176 = vsyncadd [#allocation4], 4294967168 }
  0x91   :  { %89 = vsyncpa [#allocation3], 1 }
  0x92   :  { %90 = vsyncpa [#allocation6], 1 }
  0x93   :  { %91 = vsyncpa [#allocation4], 1 }

</bundles_post_ra>
